<compile_context>
chip_gen: v6e
topology: v6e:2x2x1
jax: 0.10.0
libtpu: 0.0.40
codegen_flags: <defaults>
</compile_context>

<pallas_src>
import numpy as np
import jax
import jax.numpy as jnp
from jax.experimental import pallas as pl
from jax.experimental.pallas import tpu as pltpu


def _round_up(x, m):
    return ((x + m - 1) // m) * m


def _pick_w_chunk(W, g):
    """Chunk width along W for the in-kernel de-interleave matmul."""
    if W >= 128 and W % 128 == 0:
        return 128                      # lane-aligned, 128 MACs/element
    if W <= 256:
        return W
    best = g                            # g always divides W
    for wc in range(256, g, -1):
        if W % wc == 0 and wc % g == 0:
            best = wc
            break
    return best


def _select_matrix(wc, g):
    """0/1 matrix S with S[g*j + sw, sw*(wc//g) + j] = 1 (per-chunk W de-interleave)."""
    wgc = wc // g
    s = np.zeros((wc, wc), np.float32)
    for j in range(wgc):
        for sw in range(g):
            s[g * j + sw, sw * wgc + j] = 1.0
    return s


def _pick_row_tile(total_rows, sub, block_bytes, budget, want_split):
    """Largest row tile (over the fused C*Hg axis) whose padded footprint fits."""
    max_rows = min(total_rows, 1024)
    cands = list(range(sub, max_rows + 1, sub))
    if total_rows <= 1024 and total_rows not in cands:
        cands.append(total_rows)        # full-extent block is always layout-legal
    if not cands:
        cands = [total_rows]
    cands = sorted(cands)
    fits = [t for t in cands if block_bytes(t) <= budget] or [cands[0]]
    ti = max(fits)
    if want_split and ti >= total_rows and total_rows > cands[0]:
        # batch-1 on v7x: keep >= 2 row tiles so both TensorCores get work.
        half = _round_up((total_rows + 1) // 2, sub)
        split = ([t for t in fits if t < total_rows and t <= half]
                 or [t for t in fits if t < total_rows])
        if split:
            ti = max(split)
    if ti > 256:
        ti = (ti // 256) * 256          # keep in-kernel 256-row sub-blocking exact
    return ti


def _contract_kernel(x_ref, s_ref, o_ref):
    # x_ref: (1, R, g*W)   s_ref: (wc, wc)   o_ref: (1, g, g, R, Wg)
    g = o_ref.shape[1]
    R = x_ref.shape[1]
    gW = x_ref.shape[2]
    W = gW // g
    wc = s_ref.shape[0]
    wgc = wc // g
    nck = W // wc
    RB = min(R, 256)                    # rows per matmul (vreg-pressure bound)
    nrb = R // RB                       # wrapper guarantees exact divide
    sel = s_ref[...]                    # hoisted: loaded once per grid step
    for rb in range(nrb):
        rows = slice(rb * RB, (rb + 1) * RB)
        for sh in range(g):
            base = sh * W               # static lane-slab slice = H de-interleave
            for k in range(nck):
                part = x_ref[0, rows, base + k * wc: base + (k + 1) * wc]
                res = jnp.dot(part.astype(jnp.float32), sel,
                              preferred_element_type=jnp.float32,
                              precision=jax.lax.Precision.HIGHEST)
                res = res.astype(o_ref.dtype)
                for sw in range(g):     # W de-interleave result, sw-major slabs
                    o_ref[0, sh, sw, rows, k * wgc:(k + 1) * wgc] = \
                        res[:, sw * wgc:(sw + 1) * wgc]


def contract_forward(x, gain=2):
    """x: (N, C, H, W) NCHW.  Returns (N, C*gain*gain, H//gain, W//gain) NCHW."""
    N, C, H, W = x.shape
    g = int(gain)
    assert H % g == 0 and W % g == 0, "H and W must be divisible by gain"
    Hg, Wg = H // g, W // g
    CHg, gW = C * Hg, g * W
    itemsize = jnp.dtype(x.dtype).itemsize

    # Selection matrix for the per-chunk W de-interleave.
    wc = _pick_w_chunk(W, g)
    wgc = wc // g
    sel = jnp.asarray(_select_matrix(wc, g))

    # Device-family VMEM budgets (physical: 128 MiB v5e/v6e, 64 MiB v7x).
    try:
        kind = jax.devices()[0].device_kind.lower()
    except Exception:
        kind = ""
    if ("v5" in kind) or ("v6" in kind):
        budget, vmem_limit = 24 << 20, 64 << 20
    else:
        budget, vmem_limit = 12 << 20, 32 << 20

    # Row-tile selection with physical (8,128)-padded, double-buffered footprint.
    lane = 128
    sub = 8 * max(1, 4 // itemsize)     # sublane granule (f32:8, bf16:16, i8:32)

    def block_bytes(rows):
        r = _round_up(rows, sub)
        b_in = r * _round_up(gW, lane) * itemsize
        b_out = g * g * r * _round_up(Wg, lane) * itemsize
        b_sel = _round_up(wc, 8) * _round_up(wc, lane) * 4
        return 2 * (b_in + b_out + b_sel)   # x2: double-buffered pipeline

    ti = _pick_row_tile(CHg, sub, block_bytes, budget, want_split=(N == 1))
    n_r = pl.cdiv(CHg, ti)              # ragged last tile is fine

    # Metadata-only views: no HBM traffic outside the single pallas_call.
    x_view = x.reshape(N, CHg, gW)

    out_view = pl.pallas_call(
        _contract_kernel,
        out_shape=jax.ShapeDtypeStruct((N, g, g, CHg, Wg), x.dtype),
        grid_spec=pltpu.PrefetchScalarGridSpec(
            num_scalar_prefetch=0,
            grid=(N, n_r),
            in_specs=[
                pl.BlockSpec((1, ti, gW), lambda n, r: (n, r, 0)),
                pl.BlockSpec((wc, wc), lambda n, r: (0, 0)),
            ],
            out_specs=pl.BlockSpec((1, g, g, ti, Wg),
                                   lambda n, r: (n, 0, 0, r, 0)),
        ),
        compiler_params=pltpu.CompilerParams(
            dimension_semantics=("parallel", "parallel"),
            vmem_limit_bytes=vmem_limit),
        cost_estimate=pl.CostEstimate(
            flops=2 * N * C * H * W * wc,
            transcendentals=0,
            bytes_accessed=2 * N * C * H * W * itemsize),
    )(x_view, sel)

    # (N, g, g, C*Hg, Wg) -> (N, g*g*C, Hg, Wg) is the exact NCHW layout: free.
    return out_view.reshape(N, C * g * g, Hg, Wg)


def contract_reference(x, gain=2):
    """Pure-JAX replica of the PyTorch Contract.forward (NCHW)."""
    N, C, H, W = x.shape
    s = gain
    y = x.reshape(N, C, H // s, s, W // s, s)
    y = jnp.transpose(y, (0, 3, 5, 1, 2, 4))
    return y.reshape(N, C * s * s, H // s, W // s)


if __name__ == "__main__":
    key = jax.random.PRNGKey(0)
    k1, k2 = jax.random.split(key)
    N, C, H, W = 2, 4, 16, 16

    contract = jax.jit(contract_forward, static_argnames=("gain",))

    x = jax.random.normal(k1, (N, C, H, W), jnp.float32)
    out = jax.block_until_ready(contract(x, gain=2))
    ref = jax.block_until_ready(contract_reference(x, gain=2))
    assert out.shape == (N, C * 4, H // 2, W // 2)
    assert out.dtype == x.dtype
    assert jnp.allclose(out, ref, atol=5e-3, rtol=5e-3), "mismatch vs reference"

    # Pure permutation -> must be bit-exact on bf16-representable values.
    xi = jax.random.randint(k2, (N, C, H, W), -8, 8).astype(jnp.float32)
    outi = jax.block_until_ready(contract(xi, gain=2))
    refi = contract_reference(xi, gain=2)
    assert jnp.array_equal(outi, refi), "exact permutation check failed"

    print("KERNEL_OK")
</pallas_src>

<mosaic_0001>
module attributes {stable_mosaic.version = 11 : i64} {
  func.func @_contract_kernel(%arg0: i32, %arg1: i32, %arg2: memref<1x32x32xf32, #tpu.memory_space<vmem>>, %arg3: memref<16x16xf32, #tpu.memory_space<vmem>>, %arg4: memref<1x2x2x32x8xf32, #tpu.memory_space<vmem>>) attributes {dimension_semantics = [#tpu.dimension_semantics<parallel>, #tpu.dimension_semantics<parallel>], iteration_bounds = array<i64: 2, 1>, scalar_prefetch = 0 : i64, scratch_operands = 0 : i64, tpu.core_type = #tpu.core_type<tc>, window_params = [{transform_indices = @transform_0, window_bounds = array<i64: 1, 32, 32>}, {pipeline_mode = #tpu.pipeline_mode<synchronous>, transform_indices = @transform_1, window_bounds = array<i64: 16, 16>}, {transform_indices = @transform_2, window_bounds = array<i64: 1, 2, 2, 32, 8>}]} {
    %c0 = arith.constant 0 : index
    %c0_0 = arith.constant 0 : index
    %0 = vector.load %arg3[%c0, %c0_0] : memref<16x16xf32, #tpu.memory_space<vmem>>, vector<16x16xf32>
    %c0_1 = arith.constant 0 : index
    %c0_2 = arith.constant 0 : index
    %c0_3 = arith.constant 0 : index
    %1 = vector.load %arg2[%c0_1, %c0_2, %c0_3] : memref<1x32x32xf32, #tpu.memory_space<vmem>>, vector<1x32x16xf32>
    %2 = vector.shape_cast %1 : vector<1x32x16xf32> to vector<32x16xf32>
    %cst = arith.constant dense<0.000000e+00> : vector<32x16xf32>
    %3 = tpu.matmul %2, %0, %cst {dimension_numbers = #tpu.dot_dimension_numbers<[1], [0], [0], [1], [0, 0, 1, 1], [], []>, precision = #tpu.contract_precision<fp32>} : vector<32x16xf32>, vector<16x16xf32>, vector<32x16xf32> -> vector<32x16xf32>
    %4 = vector.extract_strided_slice %3 {offsets = [0, 0], sizes = [32, 8], strides = [1, 1]} : vector<32x16xf32> to vector<32x8xf32>
    %c0_4 = arith.constant 0 : index
    %c0_5 = arith.constant 0 : index
    %c0_6 = arith.constant 0 : index
    %c0_7 = arith.constant 0 : index
    %c0_8 = arith.constant 0 : index
    %5 = vector.load %arg4[%c0_4, %c0_5, %c0_6, %c0_7, %c0_8] : memref<1x2x2x32x8xf32, #tpu.memory_space<vmem>>, vector<1x1x1x32x8xf32>
    %6 = vector.shape_cast %5 : vector<1x1x1x32x8xf32> to vector<32x8xf32>
    %7 = vector.shape_cast %4 : vector<32x8xf32> to vector<1x1x1x32x8xf32>
    tpu.vector_store %arg4[%c0_4, %c0_5, %c0_6, %c0_7, %c0_8], %7 {strides = array<i32>} : memref<1x2x2x32x8xf32, #tpu.memory_space<vmem>>, vector<1x1x1x32x8xf32>,
    %8 = vector.extract_strided_slice %3 {offsets = [0, 8], sizes = [32, 8], strides = [1, 1]} : vector<32x16xf32> to vector<32x8xf32>
    %c0_9 = arith.constant 0 : index
    %c0_10 = arith.constant 0 : index
    %c1 = arith.constant 1 : index
    %c0_11 = arith.constant 0 : index
    %c0_12 = arith.constant 0 : index
    %9 = vector.load %arg4[%c0_9, %c0_10, %c1, %c0_11, %c0_12] : memref<1x2x2x32x8xf32, #tpu.memory_space<vmem>>, vector<1x1x1x32x8xf32>
    %10 = vector.shape_cast %9 : vector<1x1x1x32x8xf32> to vector<32x8xf32>
    %11 = vector.shape_cast %8 : vector<32x8xf32> to vector<1x1x1x32x8xf32>
    tpu.vector_store %arg4[%c0_9, %c0_10, %c1, %c0_11, %c0_12], %11 {strides = array<i32>} : memref<1x2x2x32x8xf32, #tpu.memory_space<vmem>>, vector<1x1x1x32x8xf32>,
    %c0_13 = arith.constant 0 : index
    %c0_14 = arith.constant 0 : index
    %c16 = arith.constant 16 : index
    %12 = vector.load %arg2[%c0_13, %c0_14, %c16] : memref<1x32x32xf32, #tpu.memory_space<vmem>>, vector<1x32x16xf32>
    %13 = vector.shape_cast %12 : vector<1x32x16xf32> to vector<32x16xf32>
    %cst_15 = arith.constant dense<0.000000e+00> : vector<32x16xf32>
    %14 = tpu.matmul %13, %0, %cst_15 {dimension_numbers = #tpu.dot_dimension_numbers<[1], [0], [0], [1], [0, 0, 1, 1], [], []>, precision = #tpu.contract_precision<fp32>} : vector<32x16xf32>, vector<16x16xf32>, vector<32x16xf32> -> vector<32x16xf32>
    %15 = vector.extract_strided_slice %14 {offsets = [0, 0], sizes = [32, 8], strides = [1, 1]} : vector<32x16xf32> to vector<32x8xf32>
    %c0_16 = arith.constant 0 : index
    %c1_17 = arith.constant 1 : index
    %c0_18 = arith.constant 0 : index
    %c0_19 = arith.constant 0 : index
    %c0_20 = arith.constant 0 : index
    %16 = vector.load %arg4[%c0_16, %c1_17, %c0_18, %c0_19, %c0_20] : memref<1x2x2x32x8xf32, #tpu.memory_space<vmem>>, vector<1x1x1x32x8xf32>
    %17 = vector.shape_cast %16 : vector<1x1x1x32x8xf32> to vector<32x8xf32>
    %18 = vector.shape_cast %15 : vector<32x8xf32> to vector<1x1x1x32x8xf32>
    tpu.vector_store %arg4[%c0_16, %c1_17, %c0_18, %c0_19, %c0_20], %18 {strides = array<i32>} : memref<1x2x2x32x8xf32, #tpu.memory_space<vmem>>, vector<1x1x1x32x8xf32>,
    %19 = vector.extract_strided_slice %14 {offsets = [0, 8], sizes = [32, 8], strides = [1, 1]} : vector<32x16xf32> to vector<32x8xf32>
    %c0_21 = arith.constant 0 : index
    %c1_22 = arith.constant 1 : index
    %c1_23 = arith.constant 1 : index
    %c0_24 = arith.constant 0 : index
    %c0_25 = arith.constant 0 : index
    %20 = vector.load %arg4[%c0_21, %c1_22, %c1_23, %c0_24, %c0_25] : memref<1x2x2x32x8xf32, #tpu.memory_space<vmem>>, vector<1x1x1x32x8xf32>
    %21 = vector.shape_cast %20 : vector<1x1x1x32x8xf32> to vector<32x8xf32>
    %22 = vector.shape_cast %19 : vector<32x8xf32> to vector<1x1x1x32x8xf32>
    tpu.vector_store %arg4[%c0_21, %c1_22, %c1_23, %c0_24, %c0_25], %22 {strides = array<i32>} : memref<1x2x2x32x8xf32, #tpu.memory_space<vmem>>, vector<1x1x1x32x8xf32>,
    return
  }
  func.func @transform_0(%arg0: i32, %arg1: i32) -> (i32, i32, i32) {
    %c0_i32 = arith.constant 0 : i32
    %c0_i32_0 = arith.constant 0 : i32
    return %arg0, %arg1, %c0_i32 : i32, i32, i32
  }
  func.func @transform_1(%arg0: i32, %arg1: i32) -> (i32, i32) {
    %c0_i32 = arith.constant 0 : i32
    %c0_i32_0 = arith.constant 0 : i32
    %c0_i32_1 = arith.constant 0 : i32
    return %c0_i32, %c0_i32_0 : i32, i32
  }
  func.func @transform_2(%arg0: i32, %arg1: i32) -> (i32, i32, i32, i32, i32) {
    %c0_i32 = arith.constant 0 : i32
    %c0_i32_0 = arith.constant 0 : i32
    %c0_i32_1 = arith.constant 0 : i32
    %c0_i32_2 = arith.constant 0 : i32
    return %arg0, %c0_i32, %c0_i32_0, %arg1, %c0_i32_1 : i32, i32, i32, i32, i32
  }
}

</mosaic_0001>

<bundles_post_ra>
// kernel: contract_forward.1
= control target key start
LH: loop header
LB: loop body
LE: loop exit
PB: predicated region body
PF: predicated region fallthrough
CT: control target
= control target key end

     0   :  { %s1825_s9 = smov 0   ;;  %s1827_s10 = smov 0   ;;  %s1990_s0 = inlined_call_operand.vmem [shape: f32[2,32,32], index: 0, kind: input, shape index: {}]   ;;  %s1991_s1 = inlined_call_operand.vmem [shape: f32[16,16], index: 1, kind: input, shape index: {}]   ;;  %s1992_s2 = inlined_call_operand.vmem [shape: f32[2,2,2,32,8], index: 2, kind: output, shape index: {}]  }
   0x1   :  { %s1829_s11 = smov 0  }
   0x2 LB: > { %s24_s12 = sadd.s32 1, %s1802_s10  ;;  %p1545_p0 = scmp.ge.s32.totalorder %s1806_s11, 1  ;;  %s1806_s11 = sphi %s1829_s11, %s12_s11   ;;  %s1802_s10 = sphi %s1827_s10, %s1994_s10   ;;  %s1798_s9 = sphi %s1825_s9, %s1993_s9  }
   0x3   : > { %p26_p1 = scmp.ge.s32.totalorder %s24_s12, 2  ;;  %p133_p2 = scmp.lt.s32.totalorder %s1806_s11, 3 }
   0x5   : > { %s1996_s12 = smov (%p26_p1, %s24_s12), 0  ;;  %p134_p3 = pnand %p1545_p0, %p133_p2 }
   0x6   : > { %p164_p4 = scmp.lt.s32.totalorder (!%p134_p3), %s1798_s9, 1  ;;  %s1808_s21 = smov (!%p134_p3), 112  }
   0x7   : > { %137 = sbr.rel (%p134_p3) target bundleno = 482 (0x1e2), region = 28  ;;  %s1809_s26 = smov (!%p134_p3), 120  }
   0xc   : > { %v184_v0 = vld [vmem:[%s1991_s1 + $0x8] sm:$0xff]  ;;  %v183_v1 = vld [vmem:[%s1991_s1] sm:$0xff]  ;;  %s1998_s9 = smov (!%p164_p4, %s1798_s9), 1  ;;  %vm189_vm0 = vcmask 130048   ;;  %vm790_vm1 = vcmask 64512  }
   0xd   : > { %v1849_v2 = vand.u32 4294901760, %v184_v0  ;;  %v1851_v3 = vand.u32 4294901760, %v183_v1  ;;  %s1564_s17 = sshll.u32 %s1998_s9, 5  ;;  %s1565_s22 = sshll.u32 %s1998_s9, 7 }
   0xe   : > { %s171_s20 = scalar_lea.vmem %s1990_s0, %s1564_s17  ;;  %s1939_s25 = scalar_lea.vmem %s1992_s2, %s1565_s22 }
   0xf   : > { %1638 = vmatprep.subr.mxu0 %v1849_v2  ;;  %v1857_v4 = vsub.f32 %v184_v0, %v1849_v2  ;;  %v1860_v5 = vsub.f32 %v183_v1, %v1851_v3  ;;  %v818_v8 = vld [vmem:[%s171_s20 + $0x10] sm:$0xff]  ;;  %v816_v9 = vld [vmem:[%s171_s20] sm:$0xff]  ;;  %v819_v10 = vld [vmem:[%s171_s20 + $0x18] sm:$0xff] }
  0x10   : > { %1639 = vmatpush3.msra.mxu0 %v1849_v2  ;;  %828 = vrot.lane.b32.xlu1 %v818_v8, %s1808_s21  ;;  %v817_v11 = vld [vmem:[%s171_s20 + $0x8] sm:$0xff]  ;;  %v191_v13 = vsel %vm189_vm0, %v816_v9, 0  ;;  %v197_v15 = vsel %vm189_vm0, %v818_v8, 0  ;;  %v200_v19 = vsel %vm189_vm0, %v819_v10, 0 }
  0x11   : > { %1640 = vmatprep.subr.mxu0 %v1851_v3  ;;  %v1869_v6 = vand.u32 4294901760, %v1857_v4  ;;  %v1872_v7 = vand.u32 4294901760, %v1860_v5  ;;  %824 = vrot.lane.b32.xlu0 %v816_v9, %s1808_s21  ;;  %v269_v16 = vand.u32 4294901760, %v191_v13  ;;  %v194_v17 = vsel %vm189_vm0, %v817_v11, 0 }
  0x12   : > { %1641 = vmatpush3.msra.mxu0 %v1851_v3  ;;  %v1882_v18 = vand.u32 4294901760, %v197_v15  ;;  %v279_v21 = vand.u32 4294901760, %v194_v17  ;;  %v1886_v22 = vand.u32 4294901760, %v200_v19 }
  0x13   : > { %v341_v12 = vsub.f32 %v1857_v4, %v1869_v6  ;;  %v348_v14 = vsub.f32 %v1860_v5, %v1872_v7  ;;  %1658 = vmatprep.subr.mxu0 %v1857_v4  ;;  %v270_v23 = vsub.f32 %v191_v13, %v269_v16  ;;  %1652 = vmatprep.mubr.f32.mxu1 %v269_v16 }
  0x14   : > { %v290_v25 = vsub.f32 %v197_v15, %v1882_v18  ;;  %830 = vrot.lane.b32.xlu1 %v819_v10, %s1808_s21  ;;  %v280_v26 = vsub.f32 %v194_v17, %v279_v21  ;;  %v300_v27 = vsub.f32 %v200_v19, %v1886_v22 }
  0x15   : > { %v342_v20 = vand.u32 4294901760, %v341_v12  ;;  %v349_v24 = vand.u32 4294901760, %v348_v14  ;;  %826 = vrot.lane.b32.xlu0 %v817_v11, %s1808_s21  ;;  %v271_v28 = vand.u32 4294901760, %v270_v23 }
  0x16   : > { %v291_v29 = vand.u32 4294901760, %v290_v25  ;;  %v281_v30 = vand.u32 4294901760, %v280_v26  ;;  %v301_v31 = vand.u32 4294901760, %v300_v27 }
  0x17   : > { %1648 = vmatprep.subr.mxu1 %v342_v20  ;;  %v272_v32 = vsub.f32 %v270_v23, %v271_v28 }
  0x18   : > { %1649 = vmatpush3.msra.mxu1 %v342_v20  ;;  %v292_v33 = vsub.f32 %v290_v25, %v291_v29  ;;  %v282_v34 = vsub.f32 %v280_v26, %v281_v30  ;;  %v302_v35 = vsub.f32 %v300_v27, %v301_v31 }
  0x19   : > { %1650 = vmatprep.subr.mxu1 %v349_v24  ;;  %v273_v36 = vand.u32 4294901760, %v272_v32 }
  0x1a   : > { %1651 = vmatpush3.msra.mxu1 %v349_v24  ;;  %v293_v37 = vand.u32 4294901760, %v292_v33  ;;  %v283_v38 = vand.u32 4294901760, %v282_v34  ;;  %v303_v39 = vand.u32 4294901760, %v302_v35 }
  0x1b   : > { %1653 = vmatmul.mubr.f32.vlgmr.msra.gmra.mxu1 %v279_v21  ;;  %1668 = vmatprep.subr.mxu1 %v1849_v2 }
  0x1c   : > { %1655 = vmatprep.mubr.f32.mxu1 %v1882_v18  ;;  %1669 = vmatpush3.msra.mxu1 %v1849_v2 }
  0x1d   : > { %1642 = vmatprep.mubr.f32.mxu0 %v273_v36  ;;  %1670 = vmatprep.subr.mxu1 %v1851_v3 }
  0x1e   : > { %1643 = vmatmul.mubr.f32.vlgmr.msra.gmra.mxu0 %v283_v38  ;;  %1671 = vmatpush3.msra.mxu1 %v1851_v3 }
  0x1f   : > { %1645 = vmatprep.mubr.f32.mxu0 %v293_v37  ;;  %1659 = vmatpush3.msra.mxu0 %v1857_v4 }
  0x20   : > { %1656 = vmatmul.mubr.f32.gmra.mxu1 %v1886_v22  ;;  %1660 = vmatprep.subr.mxu0 %v1860_v5 }
  0x21   : > { %1661 = vmatpush3.msra.mxu0 %v1860_v5  ;;  %1672 = vmatprep.mubr.f32.mxu1 %v271_v28 }
  0x22   : > { %1646 = vmatmul.mubr.f32.gmra.mxu0 %v303_v39  ;;  %1678 = vmatprep.subr.mxu0 %v1869_v6 }
  0x23   : > { %1662 = vmatprep.mubr.f32.mxu0 %v270_v23  ;;  %1688 = vmatprep.subr.mxu1 %v1849_v2 }
  0x24   : > { %1673 = vmatmul.mubr.f32.vlgmr.msra.gmra.mxu1 %v281_v30 }
  0x25   : > { %1675 = vmatprep.mubr.f32.mxu1 %v291_v29  ;;  %1689 = vmatpush3.msra.mxu1 %v1849_v2 }
  0x26   : > { %1663 = vmatmul.mubr.f32.vlgmr.msra.gmra.mxu0 %v280_v26  ;;  %1690 = vmatprep.subr.mxu1 %v1851_v3 }
  0x27   : > { %1665 = vmatprep.mubr.f32.mxu0 %v290_v25  ;;  %1679 = vmatpush3.msra.mxu0 %v1869_v6 }
  0x28   : > { %1676 = vmatmul.mubr.f32.gmra.mxu1 %v301_v31  ;;  %1680 = vmatprep.subr.mxu0 %v1872_v7 }
  0x29   : > { %1681 = vmatpush3.msra.mxu0 %v1872_v7  ;;  %1691 = vmatpush3.msra.mxu1 %v1851_v3 }
  0x2a   : > { %1666 = vmatmul.mubr.f32.gmra.mxu0 %v300_v27  ;;  %1692 = vmatprep.mubr.f32.mxu1 %v269_v16 }
  0x2b   : > { %1682 = vmatprep.mubr.f32.mxu0 %v269_v16  ;;  %1708 = vmatprep.subr.mxu1 %v342_v20 }
  0x2c   : > { %1693 = vmatmul.mubr.f32.vlgmr.msra.gmra.mxu1 %v279_v21  ;;  %1698 = vmatprep.subr.mxu0 %v1849_v2 }
  0x2d   : > { %1695 = vmatprep.mubr.f32.mxu1 %v1882_v18  ;;  %1709 = vmatpush3.msra.mxu1 %v342_v20 }
  0x2e   : > { %1683 = vmatmul.mubr.f32.vlgmr.msra.gmra.mxu0 %v279_v21  ;;  %1710 = vmatprep.subr.mxu1 %v349_v24 }
  0x2f   : > { %1685 = vmatprep.mubr.f32.mxu0 %v1882_v18  ;;  %1711 = vmatpush3.msra.mxu1 %v349_v24 }
  0x30   : > { %1696 = vmatmul.mubr.f32.gmra.mxu1 %v1886_v22  ;;  %1699 = vmatpush3.msra.mxu0 %v1849_v2 }
  0x31   : > { %1700 = vmatprep.subr.mxu0 %v1851_v3  ;;  %1728 = vmatprep.subr.mxu1 %v1849_v2 }
  0x32   : > { %1686 = vmatmul.mubr.f32.gmra.mxu0 %v1886_v22 }
  0x33   : > { %1701 = vmatpush3.msra.mxu0 %v1851_v3 }
  0x34   : > { %1718 = vmatprep.subr.mxu0 %v1857_v4 }
  0x82   : > { %v829_v40 = vpop.permute.xlu1 %828 }
  0x83   : > { %v825_v41 = vpop.permute.xlu0 %824  ;;  %v836_v42 = vsel %vm189_vm0, %v829_v40, 0 }
  0x84   : > { %v832_v43 = vsel %vm189_vm0, %v825_v41, 0  ;;  %v927_v44 = vand.u32 4294901760, %v836_v42 }
  0x85   : > { %v907_v45 = vand.u32 4294901760, %v832_v43 }
  0x86   : > { %v928_v46 = vsub.f32 %v836_v42, %v927_v44  ;;  %v831_v48 = vpop.permute.xlu1 %830 }
  0x87   : > { %v908_v47 = vsub.f32 %v832_v43, %v907_v45  ;;  %v827_v49 = vpop.permute.xlu0 %826  ;;  %1712 = vmatprep.mubr.f32.mxu1 %v907_v45  ;;  %v838_v50 = vsel %vm189_vm0, %v831_v48, 0 }
  0x88   : > { %v834_v51 = vsel %vm189_vm0, %v827_v49, 0  ;;  %v937_v53 = vand.u32 4294901760, %v838_v50  ;;  %v929_v55 = vand.u32 4294901760, %v928_v46 }
  0x89   : > { %v909_v52 = vand.u32 4294901760, %v908_v47  ;;  %v917_v54 = vand.u32 4294901760, %v834_v51 }
  0x8a   : > { %v938_v56 = vsub.f32 %v838_v50, %v937_v53  ;;  %v930_v62 = vsub.f32 %v928_v46, %v929_v55 }
  0x8b   : > { %v918_v57 = vsub.f32 %v834_v51, %v917_v54  ;;  %1713 = vmatmul.mubr.f32.vlgmr.msra.gmra.mxu1 %v917_v54  ;;  %v910_v58 = vsub.f32 %v908_v47, %v909_v52 }
  0x8c   : > { %1715 = vmatprep.mubr.f32.mxu1 %v927_v44  ;;  %1729 = vmatpush3.msra.mxu1 %v1849_v2  ;;  %v939_v59 = vand.u32 4294901760, %v938_v56  ;;  %v931_v8 = vand.u32 4294901760, %v930_v62 }
  0x8d   : > { %v919_v60 = vand.u32 4294901760, %v918_v57  ;;  %v911_v61 = vand.u32 4294901760, %v910_v58  ;;  %1730 = vmatprep.subr.mxu1 %v1851_v3 }
  0x8e   : > { %1731 = vmatpush3.msra.mxu1 %v1851_v3  ;;  %v940_v1 = vsub.f32 %v938_v56, %v939_v59 }
  0x8f   : > { %v920_v63 = vsub.f32 %v918_v57, %v919_v60  ;;  %1702 = vmatprep.mubr.f32.mxu0 %v911_v61  ;;  %1716 = vmatmul.mubr.f32.gmra.mxu1 %v937_v53 }
  0x90   : > { %1732 = vmatprep.mubr.f32.mxu1 %v909_v52  ;;  %1748 = vmatprep.subr.mxu1 %v1849_v2  ;;  %v941_v9 = vand.u32 4294901760, %v940_v1 }
  0x91   : > { %v921_v0 = vand.u32 4294901760, %v920_v63 }
  0x93   : > { %1703 = vmatmul.mubr.f32.vlgmr.msra.gmra.mxu0 %v921_v0  ;;  %1733 = vmatmul.mubr.f32.vlgmr.msra.gmra.mxu1 %v919_v60 }
  0x94   : > { %1719 = vmatpush3.msra.mxu0 %v1857_v4  ;;  %1705 = vmatprep.mubr.f32.mxu0 %v931_v8 }
  0x95   : > { %1735 = vmatprep.mubr.f32.mxu1 %v929_v55  ;;  %1720 = vmatprep.subr.mxu0 %v1860_v5 }
  0x96   : > { %1721 = vmatpush3.msra.mxu0 %v1860_v5  ;;  %1749 = vmatpush3.msra.mxu1 %v1849_v2 }
  0x97   : > { %1706 = vmatmul.mubr.f32.gmra.mxu0 %v941_v9  ;;  %1736 = vmatmul.mubr.f32.gmra.mxu1 %v939_v59 }
  0x98   : > { %1722 = vmatprep.mubr.f32.mxu0 %v908_v47  ;;  %1752 = vmatprep.mubr.f32.mxu1 %v907_v45 }
  0x99   : > { %1750 = vmatprep.subr.mxu1 %v1851_v3  ;;  %1738 = vmatprep.subr.mxu0 %v1869_v6 }
  0x9a   : > { %1751 = vmatpush3.msra.mxu1 %v1851_v3 }
  0x9b   : > { %1723 = vmatmul.mubr.f32.vlgmr.msra.gmra.mxu0 %v918_v57  ;;  %1753 = vmatmul.mubr.f32.vlgmr.msra.gmra.mxu1 %v917_v54 }
  0x9c   : > { %1739 = vmatpush3.msra.mxu0 %v1869_v6  ;;  %1725 = vmatprep.mubr.f32.mxu0 %v928_v46 }
  0x9d   : > { %1755 = vmatprep.mubr.f32.mxu1 %v927_v44  ;;  %1740 = vmatprep.subr.mxu0 %v1872_v7 }
  0x9e   : > { %1741 = vmatpush3.msra.mxu0 %v1872_v7 }
  0x9f   : > { %1726 = vmatmul.mubr.f32.gmra.mxu0 %v938_v56  ;;  %1756 = vmatmul.mubr.f32.gmra.mxu1 %v937_v53 }
  0xa0   : > { %1742 = vmatprep.mubr.f32.mxu0 %v907_v45 }
  0xa3   : > { %1743 = vmatmul.mubr.f32.vlgmr.msra.gmra.mxu0 %v917_v54 }
  0xa4   : > { %1745 = vmatprep.mubr.f32.mxu0 %v927_v44 }
  0xa7   : > { %1746 = vmatmul.mubr.f32.gmra.mxu0 %v937_v53 }
  0xdb   : > { %v1654_v2 = vpop.f32.mrf.mxu1 }
  0xdd   : > { %v386_v4 = vpop.f32.mrf.mxu1 }
  0xde   : > { %v1644_v5 = vpop.f32.mrf.mxu0 }
  0xdf   : > { %v393_v6 = vadd.f32 %v1654_v2, %v1644_v5 }
  0xe0   : > { %v275_v3 = vpop.f32.mrf.mxu0  ;;  %v1657_v10 = vpop.f32.mrf.mxu1 }
  0xe1   : > { %v387_v15 = vadd.f32 %v386_v4, %v275_v3 }
  0xe2   : > { %v1647_v11 = vpop.f32.mrf.mxu0  ;;  %v398_v12 = vpop.f32.mrf.mxu1 }
  0xe3   : > { %v405_v17 = vadd.f32 %v1657_v10, %v1647_v11 }
  0xe4   : > { %v295_v13 = vpop.f32.mrf.mxu0  ;;  %v1674_v14 = vpop.f32.mrf.mxu1 }
  0xe5   : > { %v399_v21 = vadd.f32 %v398_v12, %v295_v13 }
  0xe6   : > { %v1664_v16 = vpop.f32.mrf.mxu0  ;;  %v576_v7 = vpop.f32.mrf.mxu1 }
  0xe7   : > { %v488_v18 = vadd.f32 %v1664_v16, %v393_v6 }
  0xe8   : > { %v480_v19 = vpop.f32.mrf.mxu0  ;;  %v1677_v20 = vpop.f32.mrf.mxu1 }
  0xe9   : > { %v481_v22 = vadd.f32 %v480_v19, %v387_v15  ;;  %v585_v25 = vadd.f32 %v1674_v14, %v488_v18 }
  0xea   : > { %v1667_v23 = vpop.f32.mrf.mxu0  ;;  %v592_v24 = vpop.f32.mrf.mxu1 }
  0xeb   : > { %v502_v26 = vadd.f32 %v1667_v23, %v405_v17  ;;  %v577_v29 = vadd.f32 %v576_v7, %v481_v22 }
  0xec   : > { %v494_v27 = vpop.f32.mrf.mxu0  ;;  %v1694_v28 = vpop.f32.mrf.mxu1 }
  0xed   : > { %v495_v30 = vadd.f32 %v494_v27, %v399_v21  ;;  %v601_v33 = vadd.f32 %v1677_v20, %v502_v26 }
  0xee   : > { %v1684_v31 = vpop.f32.mrf.mxu0  ;;  %v768_v32 = vpop.f32.mrf.mxu1 }
  0xef   : > { %v684_v34 = vadd.f32 %v1684_v31, %v585_v25  ;;  %v593_v37 = vadd.f32 %v592_v24, %v495_v30 }
  0xf0   : > { %v677_v35 = vpop.f32.mrf.mxu0  ;;  %v1697_v36 = vpop.f32.mrf.mxu1 }
  0xf1   : > { %v678_v38 = vadd.f32 %v677_v35, %v577_v29  ;;  %v775_v39 = vadd.f32 %v1694_v28, %v684_v34 }
  0xf2   : > { %v1687_v40 = vpop.f32.mrf.mxu0  ;;  %v780_v44 = vpop.f32.mrf.mxu1 }
  0xf3   : > { %792 = vst.msk [vmem:[%s1939_s25 + $0x8] sm:$0xff] %vm790_vm1, %v775_v39  ;;  %v696_v41 = vadd.f32 %v1687_v40, %v601_v33  ;;  %v769_v42 = vadd.f32 %v768_v32, %v678_v38  ;;  %801 = vrot.lane.b32.xlu1 %v775_v39, %s1809_s26 }
  0xf4   : > { %v689_v43 = vpop.f32.mrf.mxu0 }
  0xf5   : > { %791 = vst.msk [vmem:[%s1939_s25] sm:$0xff] %vm790_vm1, %v769_v42  ;;  %v690_v45 = vadd.f32 %v689_v43, %v593_v37  ;;  %v787_v46 = vadd.f32 %v1697_v36, %v696_v41  ;;  %799 = vrot.lane.b32.xlu0 %v769_v42, %s1809_s26 }
  0xf7   : > { %794 = vst.msk [vmem:[%s1939_s25 + $0x18] sm:$0xff] %vm790_vm1, %v787_v46  ;;  %v781_v47 = vadd.f32 %v780_v44, %v690_v45  ;;  %805 = vrot.lane.b32.xlu1 %v787_v46, %s1809_s26 }
  0xf9   : > { %793 = vst.msk [vmem:[%s1939_s25 + $0x10] sm:$0xff] %vm790_vm1, %v781_v47  ;;  %803 = vrot.lane.b32.xlu0 %v781_v47, %s1809_s26 }
 0x14b   : > { %v1714_v48 = vpop.f32.mrf.mxu1 }
 0x14d   : > { %v1024_v49 = vpop.f32.mrf.mxu1 }
 0x14f   : > { %v1717_v50 = vpop.f32.mrf.mxu1 }
 0x151   : > { %v1036_v51 = vpop.f32.mrf.mxu1 }
 0x153   : > { %v1704_v52 = vpop.f32.mrf.mxu0  ;;  %v1734_v53 = vpop.f32.mrf.mxu1 }
 0x154   : > { %v1031_v61 = vadd.f32 %v1714_v48, %v1704_v52 }
 0x155   : > { %v913_v54 = vpop.f32.mrf.mxu0  ;;  %v1214_v55 = vpop.f32.mrf.mxu1 }
 0x156   : > { %v1025_v63 = vadd.f32 %v1024_v49, %v913_v54 }
 0x157   : > { %v1707_v56 = vpop.f32.mrf.mxu0  ;;  %v1737_v57 = vpop.f32.mrf.mxu1 }
 0x158   : > { %v1043_v9 = vadd.f32 %v1717_v50, %v1707_v56 }
 0x159   : > { %v933_v58 = vpop.f32.mrf.mxu0  ;;  %v1230_v59 = vpop.f32.mrf.mxu1 }
 0x15a   : > { %v1037_v5 = vadd.f32 %v1036_v51, %v933_v58 }
 0x15b   : > { %v1724_v60 = vpop.f32.mrf.mxu0  ;;  %v1754_v1 = vpop.f32.mrf.mxu1 }
 0x15c   : > { %v1126_v0 = vadd.f32 %v1724_v60, %v1031_v61 }
 0x15d   : > { %v1118_v62 = vpop.f32.mrf.mxu0  ;;  %v1406_v11 = vpop.f32.mrf.mxu1 }
 0x15e   : > { %v1119_v2 = vadd.f32 %v1118_v62, %v1025_v63  ;;  %v1223_v10 = vadd.f32 %v1734_v53, %v1126_v0 }
 0x15f   : > { %v1727_v8 = vpop.f32.mrf.mxu0  ;;  %v1757_v20 = vpop.f32.mrf.mxu1 }
 0x160   : > { %v1140_v3 = vadd.f32 %v1727_v8, %v1043_v9  ;;  %v1215_v14 = vadd.f32 %v1214_v55, %v1119_v2 }
 0x161   : > { %v1132_v4 = vpop.f32.mrf.mxu0  ;;  %v1418_v30 = vpop.f32.mrf.mxu1 }
 0x162   : > { %v1133_v6 = vadd.f32 %v1132_v4, %v1037_v5  ;;  %v1239_v18 = vadd.f32 %v1737_v57, %v1140_v3 }
 0x163   : > { %v1744_v12 = vpop.f32.mrf.mxu0 }
 0x164   : > { %v1322_v13 = vadd.f32 %v1744_v12, %v1223_v10  ;;  %v1231_v24 = vadd.f32 %v1230_v59, %v1133_v6 }
 0x165   : > { %v802_v15 = vpop.permute.xlu1 %801  ;;  %v1315_v16 = vpop.f32.mrf.mxu0 }
 0x166   : > { %1551 = vst.msk [vmem:[%s1939_s25 + $0x28] sm:$0xff] %vm790_vm1, %v802_v15  ;;  %v1413_v7 = vadd.f32 %v1754_v1, %v1322_v13  ;;  %v1316_v17 = vadd.f32 %v1315_v16, %v1215_v14 }
 0x167   : > { %v800_v19 = vpop.permute.xlu0 %799  ;;  %v1747_v21 = vpop.f32.mrf.mxu0 }
 0x168   : > { %1550 = vst.msk [vmem:[%s1939_s25 + $0x20] sm:$0xff] %vm790_vm1, %v800_v19  ;;  %1555 = vst.msk [vmem:[%s1939_s25 + $0x48] sm:$0xff] %vm790_vm1, %v1413_v7  ;;  %v1407_v22 = vadd.f32 %v1406_v11, %v1316_v17  ;;  %v1334_v23 = vadd.f32 %v1747_v21, %v1239_v18  ;;  %1439 = vrot.lane.b32.xlu1 %v1413_v7, %s1809_s26 }
 0x169   : > { %v806_v25 = vpop.permute.xlu1 %805  ;;  %v1327_v26 = vpop.f32.mrf.mxu0 }
 0x16a   : > { %1553 = vst.msk [vmem:[%s1939_s25 + $0x38] sm:$0xff] %vm790_vm1, %v806_v25  ;;  %1554 = vst.msk [vmem:[%s1939_s25 + $0x40] sm:$0xff] %vm790_vm1, %v1407_v22  ;;  %v1425_v27 = vadd.f32 %v1757_v20, %v1334_v23  ;;  %v1328_v28 = vadd.f32 %v1327_v26, %v1231_v24  ;;  %1437 = vrot.lane.b32.xlu0 %v1407_v22, %s1809_s26 }
 0x16b   : > { %v804_v29 = vpop.permute.xlu0 %803 }
 0x16c   : > { %1552 = vst.msk [vmem:[%s1939_s25 + $0x30] sm:$0xff] %vm790_vm1, %v804_v29  ;;  %1557 = vst.msk [vmem:[%s1939_s25 + $0x58] sm:$0xff] %vm790_vm1, %v1425_v27  ;;  %v1419_v31 = vadd.f32 %v1418_v30, %v1328_v28  ;;  %1443 = vrot.lane.b32.xlu1 %v1425_v27, %s1809_s26 }
 0x16e   : > { %1556 = vst.msk [vmem:[%s1939_s25 + $0x50] sm:$0xff] %vm790_vm1, %v1419_v31  ;;  %1441 = vrot.lane.b32.xlu0 %v1419_v31, %s1809_s26 }
 0x1da   : > { %v1440_v32 = vpop.permute.xlu1 %1439 }
 0x1db   : > { %1559 = vst.msk [vmem:[%s1939_s25 + $0x68] sm:$0xff] %vm790_vm1, %v1440_v32 }
 0x1dc   : > { %v1438_v33 = vpop.permute.xlu0 %1437 }
 0x1dd   : > { %1558 = vst.msk [vmem:[%s1939_s25 + $0x60] sm:$0xff] %vm790_vm1, %v1438_v33 }
 0x1de   : > { %v1444_v34 = vpop.permute.xlu1 %1443 }
 0x1df   : > { %1561 = vst.msk [vmem:[%s1939_s25 + $0x78] sm:$0xff] %vm790_vm1, %v1444_v34 }
 0x1e0   : > { %v1442_v35 = vpop.permute.xlu0 %1441 }
 0x1e1   : > { %1560 = vst.msk [vmem:[%s1939_s25 + $0x70] sm:$0xff] %vm790_vm1, %v1442_v35 }
 0x1e2 PF: > { %s12_s11 = sadd.s32 1, %s1806_s11   ;;  %s1993_s9 = smov %s1802_s10 }
 0x1e3   : > { %p9_p5 = scmp.ge.s32.totalorder %s12_s11, 4   ;;  %s1994_s10 = smov %s1996_s12 }
 0x1e5   :  { %11 = sbr.rel (!%p9_p5) target bundleno = 2 (0x2), region = 61 }

</bundles_post_ra>
